<compile_context>
chip_gen: v7x
topology: tpu7x:2x2x1
jax: 0.10.0
libtpu: 0.0.40
codegen_flags: <defaults>
</compile_context>

<pallas_src>
from abc import ABC, abstractmethod
import functools

import jax
import jax.numpy as jnp
from jax.experimental import pallas as pl
from jax.experimental.pallas import tpu as pltpu


# ---------------------------------------------------------------------------
# Helpers
# ---------------------------------------------------------------------------
def _round_up(x: int, m: int) -> int:
    return ((x + m - 1) // m) * m


def _split(dim_aligned: int, target: int, align: int = 128, min_tiles: int = 1):
    """Split `dim_aligned` (multiple of align) into n tiles of size `tile`
    (multiple of align, tile * n >= dim_aligned, tile <= ~target)."""
    n = max(min_tiles, -(-dim_aligned // max(target, align)))
    n = min(n, dim_aligned // align)
    n = max(n, 1)
    tile = _round_up(-(-dim_aligned // n), align)
    return tile, n


def plan_linear(N: int, M: int, *, tk_target: int = 4096, tn_target: int = 1024):
    """Generation-aware tiling plan for y[B,M] = x[B,N] @ W[N,M]."""
    # Conservative default = v7x-class (64 MiB physical VMEM); raise when the
    # runtime reports a bigger chip (v5e / v6e: 128 MiB).
    vmem_phys = 64 * 1024 * 1024
    try:
        vmem_phys = int(pltpu.get_tpu_info().vmem_capacity_bytes)
    except Exception:
        pass
    if vmem_phys <= 64 * 1024 * 1024:
        vmem_limit = 48 * 1024 * 1024
    else:
        vmem_limit = 96 * 1024 * 1024
    budget = (vmem_limit * 3) // 4          # working-set budget (double buffers)

    Np0 = _round_up(max(N, 1), 128)
    Mp0 = _round_up(max(M, 1), 128)

    # Keep >= 2 tiles on the (only) parallel axis so v7x's two TensorCores
    # both get work, whenever M allows it.
    min_m_tiles = 2 if Mp0 >= 256 else 1
    tn, nm = _split(Mp0, tn_target, 128, min_tiles=min_m_tiles)
    tk, nk = _split(Np0, tk_target, 128)

    # Shrink the K tile (then the M tile) until the double-buffered W tile
    # (bf16) fits the budget.  Rarely triggers with the default targets.
    def w_db_bytes(tk_, tn_):
        return 2 * tk_ * tn_ * 2

    while w_db_bytes(tk, tn) > budget and nk < Np0 // 128:
        nk += 1
        tk = _round_up(-(-Np0 // nk), 128)
    while w_db_bytes(tk, tn) > budget and nm < Mp0 // 128:
        nm += 1
        tn = _round_up(-(-Mp0 // nm), 128)

    return dict(
        tk=tk, tn=tn, nk=nk, nm=nm,
        Np=tk * nk, Mp=tn * nm,
        vmem_limit=vmem_limit, budget=budget,
    )


# ---------------------------------------------------------------------------
# Pallas kernels: y = x @ W, grid = (m-tiles, k-tiles), reduction axis last.
# Output block index is constant across K -> VMEM-resident f32 accumulator.
# ---------------------------------------------------------------------------
def _linear_kernel_tiled_x(x_ref, w_ref, o_ref):
    k = pl.program_id(1)

    @pl.when(k == 0)
    def _():
        o_ref[...] = jnp.zeros_like(o_ref)

    o_ref[...] += jnp.dot(x_ref[...], w_ref[...], preferred_element_type=jnp.float32)


def _linear_kernel_resident_x(x_ref, w_ref, o_ref, *, tk):
    # x_ref holds the full (Bp, Np) panel; slice the K chunk in-kernel so x is
    # DMA'd once instead of once per M-tile.
    k = pl.program_id(1)

    @pl.when(k == 0)
    def _():
        o_ref[...] = jnp.zeros_like(o_ref)

    start = pl.multiple_of(k * tk, tk)
    x_blk = x_ref[:, pl.ds(start, tk)]
    o_ref[...] += jnp.dot(x_blk, w_ref[...], preferred_element_type=jnp.float32)


def pallas_linear_apply(x_flat: jax.Array, w_padded: jax.Array, plan: dict,
                        out_cols: int) -> jax.Array:
    """y = x_flat @ W, with W already bf16 + padded to (plan.Np, plan.Mp).

    x_flat: (B, N) any float dtype; returns (B, out_cols) float32.
    """
    B, N = x_flat.shape
    Np, Mp = w_padded.shape
    tk, tn, nk, nm = plan["tk"], plan["tn"], plan["nk"], plan["nm"]
    assert Np == tk * nk and Mp == tn * nm, (Np, Mp, plan)

    # bf16 packs 16 sublanes per vreg -> pad the tiny batch axis to 16.
    Bp = max(16, _round_up(B, 16))

    x_p = x_flat.astype(jnp.bfloat16)
    if (Bp, Np) != (B, N):
        x_p = jnp.pad(x_p, ((0, Bp - B), (0, Np - N)))

    # Hold x VMEM-resident when it fits next to the double-buffered W tile and
    # the output tiles; otherwise fall back to streaming (Bp, tk) x tiles.
    x_bytes = Bp * Np * 2
    w_db_bytes = 2 * tk * tn * 2
    o_db_bytes = 2 * Bp * tn * 4
    resident_x = (2 * x_bytes + w_db_bytes + o_db_bytes) <= plan["budget"]

    if resident_x:
        kernel = functools.partial(_linear_kernel_resident_x, tk=tk)
        x_spec = pl.BlockSpec((Bp, Np), lambda m, k: (0, 0))
        x_traffic = Bp * Np * 2
    else:
        kernel = _linear_kernel_tiled_x
        x_spec = pl.BlockSpec((Bp, tk), lambda m, k: (0, k))
        x_traffic = nm * Bp * Np * 2          # x re-fetched once per M tile

    out = pl.pallas_call(
        kernel,
        out_shape=jax.ShapeDtypeStruct((Bp, Mp), jnp.float32),
        grid_spec=pltpu.PrefetchScalarGridSpec(
            num_scalar_prefetch=0,
            grid=(nm, nk),                                     # reduction last
            in_specs=[
                x_spec,
                # TODO(synk): if a v7x profile still shows exposed W DMA, add
                # pipeline_mode=pl.Buffered(3) here.
                pl.BlockSpec((tk, tn), lambda m, k: (k, m)),
            ],
            out_specs=pl.BlockSpec((Bp, tn), lambda m, k: (0, m)),
        ),
        compiler_params=pltpu.CompilerParams(
            dimension_semantics=("parallel", "arbitrary"),
            vmem_limit_bytes=plan["vmem_limit"],
        ),
        cost_estimate=pl.CostEstimate(
            flops=2 * Bp * Np * Mp,
            transcendentals=0,
            bytes_accessed=Np * Mp * 2 + x_traffic + Bp * Mp * 4,
        ),
    )(x_p, w_padded)

    return out[:B, :out_cols]


# ---------------------------------------------------------------------------
# JAX port of the abstract Operator base class
# ---------------------------------------------------------------------------
class Operator(ABC):
    """Generic forward model A for inverse problems (JAX/Pallas port)."""

    def __init__(self, x_shape) -> None:
        self.x_shape = tuple(x_shape)
        self.y_shape = self._infer_y_shape(self.x_shape)

    def _infer_y_shape(self, x_shape):
        # jax.eval_shape: no compile, no device execution at construction time.
        dummy = jax.ShapeDtypeStruct((1, *x_shape), jnp.float32)
        y = jax.eval_shape(self.apply, dummy)
        return tuple(y.shape[1:])

    @abstractmethod
    def apply(self, x: jax.Array) -> jax.Array:
        """Forward map y = A(x), x: (*batch, *x_shape) -> y: (*batch, *y_shape)."""

    def apply_transpose(self, y: jax.Array) -> jax.Array:
        raise NotImplementedError("Transpose not defined for this operator")

    def apply_pseudo_inverse(self, y: jax.Array) -> jax.Array:
        raise NotImplementedError("Pseudo-inverse not defined for this operator")

    def forward(self, x: jax.Array) -> jax.Array:
        return self.apply(x)

    def __call__(self, x: jax.Array) -> jax.Array:
        return self.forward(x)


class GaussianLinearOperator(Operator):
    """Concrete Operator: y = A @ vec(x), A ~ deterministic Gaussian buffer."""

    def __init__(self, x_shape, m: int) -> None:
        n = 1
        for d in x_shape:
            n *= d
        self._n = n
        self._m = m
        # Deterministic "buffer" initialization (stand-in for a registered buffer).
        key = jax.random.PRNGKey(42)
        self.A = jax.random.normal(key, (m, n), dtype=jnp.float32) / jnp.sqrt(n)

        # Pre-cast + pre-pad ONCE: the kernel is HBM-bound on W, so a per-call
        # jnp.pad would roughly double weight traffic for unaligned shapes.
        # (Two bf16 copies of A are kept -> HBM capacity, not correctness.)
        # TODO(synk): optional int8 (v5e/v6e) / fp8 (v7x) weight streaming for
        # a further ~2x on the bandwidth-bound path.
        self._fwd_plan = plan_linear(n, m)          # W: (N, M) = A.T
        w = jnp.transpose(self.A).astype(jnp.bfloat16)
        self._W = jnp.pad(
            w, ((0, self._fwd_plan["Np"] - n), (0, self._fwd_plan["Mp"] - m)))

        self._adj_plan = plan_linear(m, n)          # W: (M, N) = A
        a = self.A.astype(jnp.bfloat16)
        self._A_pad = jnp.pad(
            a, ((0, self._adj_plan["Np"] - m), (0, self._adj_plan["Mp"] - n)))

        super().__init__(x_shape)

    def apply(self, x: jax.Array) -> jax.Array:
        batch = x.shape[: x.ndim - len(self.x_shape)]
        x_flat = x.reshape((-1, self._n))
        y = pallas_linear_apply(x_flat, self._W, self._fwd_plan, self._m)
        return y.reshape(batch + (self._m,))

    def apply_transpose(self, y: jax.Array) -> jax.Array:
        batch = y.shape[: y.ndim - 1]
        y_flat = y.reshape((-1, self._m))
        x_flat = pallas_linear_apply(y_flat, self._A_pad, self._adj_plan, self._n)
        return x_flat.reshape(batch + self.x_shape)

    # TODO(synk): apply_pseudo_inverse would require an in-kernel least-squares
    # solve (normal equations / SVD); left unimplemented as in the base class.


# ---------------------------------------------------------------------------
# Demo / smoke test
# ---------------------------------------------------------------------------
if __name__ == "__main__":
    x_shape = (4, 16, 16)   # C, H, W  -> N = 1024
    m = 256                 # number of measurements
    batch = 2

    op = GaussianLinearOperator(x_shape, m)
    assert op.y_shape == (m,), op.y_shape

    key = jax.random.PRNGKey(0)
    x = jax.random.normal(key, (batch, *x_shape), dtype=jnp.float32)

    y = op(x)
    y = jax.block_until_ready(y)

    # Reference check (plain JAX, f32).  Weights/activations stream as bf16 in
    # the kernel (accumulation is f32), so tolerance is loosened accordingly.
    y_ref = x.reshape(batch, -1) @ op.A.T
    assert y.shape == (batch, m)
    assert jnp.allclose(y, y_ref, atol=3e-2, rtol=3e-2)

    # Adjoint exercised through the same kernel (N output axis tiled).
    xt = jax.block_until_ready(op.apply_transpose(y))
    assert xt.shape == (batch, *x_shape)
    xt_ref = (y.reshape(batch, -1) @ op.A).reshape(batch, *x_shape)
    assert jnp.allclose(xt, xt_ref, atol=3e-2, rtol=3e-2)

    print("KERNEL_OK")
</pallas_src>

<mosaic_0001>
module attributes {stable_mosaic.version = 11 : i64} {
  func.func @_linear_kernel_resident_x(%arg0: i32, %arg1: i32, %arg2: memref<16x1024xbf16, #tpu.memory_space<vmem>>, %arg3: memref<1024x128xbf16, #tpu.memory_space<vmem>>, %arg4: memref<16x128xf32, #tpu.memory_space<vmem>>) attributes {dimension_semantics = [#tpu.dimension_semantics<parallel>, #tpu.dimension_semantics<arbitrary>], iteration_bounds = array<i64: 2, 1>, scalar_prefetch = 0 : i64, scratch_operands = 0 : i64, tpu.core_type = #tpu.core_type<tc>, window_params = [{pipeline_mode = #tpu.pipeline_mode<synchronous>, transform_indices = @transform_0, window_bounds = array<i64: 16, 1024>}, {transform_indices = @transform_1, window_bounds = array<i64: 1024, 128>}, {transform_indices = @transform_2, window_bounds = array<i64: 16, 128>}]} {
    %c0_i32 = arith.constant 0 : i32
    %0 = arith.cmpi eq, %arg1, %c0_i32 : i32
    %1 = arith.extui %0 : i1 to i32
    %c0_i32_0 = arith.constant 0 : i32
    %2 = arith.cmpi ne, %1, %c0_i32_0 : i32
    scf.if %2 {
      %cst_7 = arith.constant 0.000000e+00 : f32
      %12 = vector.broadcast %cst_7 : f32 to vector<16x128xf32>
      %c0_8 = arith.constant 0 : index
      %c0_9 = arith.constant 0 : index
      %13 = vector.load %arg4[%c0_8, %c0_9] : memref<16x128xf32, #tpu.memory_space<vmem>>, vector<16x128xf32>
      tpu.vector_store %arg4[%c0_8, %c0_9], %12 {strides = array<i32>} : memref<16x128xf32, #tpu.memory_space<vmem>>, vector<16x128xf32>,
    } else {
    }
    %c1024_i32 = arith.constant 1024 : i32
    %3 = arith.muli %arg1, %c1024_i32 : i32
    %4 = tpu.assume_multiple %3, 1024 : i32
    %c0 = arith.constant 0 : index
    %5 = arith.index_cast %4 : i32 to index
    %6 = vector.load %arg2[%c0, %5] : memref<16x1024xbf16, #tpu.memory_space<vmem>>, vector<16x1024xbf16>
    %c0_1 = arith.constant 0 : index
    %c0_2 = arith.constant 0 : index
    %7 = vector.load %arg4[%c0_1, %c0_2] : memref<16x128xf32, #tpu.memory_space<vmem>>, vector<16x128xf32>
    %c0_3 = arith.constant 0 : index
    %c0_4 = arith.constant 0 : index
    %8 = vector.load %arg3[%c0_3, %c0_4] : memref<1024x128xbf16, #tpu.memory_space<vmem>>, vector<1024x128xbf16>
    %cst = arith.constant dense<0.000000e+00> : vector<16x128xf32>
    %9 = tpu.matmul %6, %8, %cst {dimension_numbers = #tpu.dot_dimension_numbers<[1], [0], [0], [1], [0, 0, 1, 1], [], []>} : vector<16x1024xbf16>, vector<1024x128xbf16>, vector<16x128xf32> -> vector<16x128xf32>
    %10 = arith.addf %7, %9 : vector<16x128xf32>
    %c0_5 = arith.constant 0 : index
    %c0_6 = arith.constant 0 : index
    %11 = vector.load %arg4[%c0_5, %c0_6] : memref<16x128xf32, #tpu.memory_space<vmem>>, vector<16x128xf32>
    tpu.vector_store %arg4[%c0_5, %c0_6], %10 {strides = array<i32>} : memref<16x128xf32, #tpu.memory_space<vmem>>, vector<16x128xf32>,
    return
  }
  func.func @transform_0(%arg0: i32, %arg1: i32) -> (i32, i32) {
    %c0_i32 = arith.constant 0 : i32
    %c0_i32_0 = arith.constant 0 : i32
    %c0_i32_1 = arith.constant 0 : i32
    return %c0_i32, %c0_i32_0 : i32, i32
  }
  func.func @transform_1(%arg0: i32, %arg1: i32) -> (i32, i32) {
    %c0_i32 = arith.constant 0 : i32
    return %arg1, %arg0 : i32, i32
  }
  func.func @transform_2(%arg0: i32, %arg1: i32) -> (i32, i32) {
    %c0_i32 = arith.constant 0 : i32
    %c0_i32_0 = arith.constant 0 : i32
    return %c0_i32, %arg0 : i32, i32
  }
}

</mosaic_0001>

<bundles_post_ra>
// kernel: tpu_custom_call.1
= control target key start
LH: loop header
LB: loop body
LE: loop exit
PB: predicated region body
PF: predicated region fallthrough
CT: control target
= control target key end

     0   :  { %7 = vsyncpa [#allocation3], 0  ;;  %s1826_s0 = inlined_call_operand.hbm [shape: bf16[16,1024], index: 0, kind: input, shape index: {}]   ;;  %s1827_s1 = inlined_call_operand.hbm [shape: bf16[1024,256], index: 1, kind: input, shape index: {}]   ;;  %s1828_s2 = inlined_call_operand.hbm [shape: f32[16,256], index: 2, kind: output, shape index: {}]  }
   0x1   :  { %8 = vsyncpa [#allocation6], 0 }
   0x2   :  { %10 = vsyncpa [#allocation6 + $0x1], 0 }
   0x3   :  { %11 = vsyncpa [#allocation4], 0 }
   0x4   :  { %13 = vsyncpa [#allocation4 + $0x1], 0  ;;  %s1539_s9 = smov 0   ;;  %s1541_s10 = smov 0  }
   0x5   :  { %s1543_s11 = smov 0   ;;  %s1545_s12 = smov 0  }
   0x6   :  { %s1547_s13 = smov 0   ;;  %s1549_s14 = smov 0  }
   0x7 LB: > { %s1046_s15 = sadd.s32 4294967295, %s1511_s14   ;;  %s1047_s16 = sadd.s32 4294967294, %s1511_s14   ;;  %s1511_s14 = sphi %s1549_s14, %s19_s14   ;;  %s1507_s13 = sphi %s1547_s13, %s1854_s13   ;;  %s1503_s12 = sphi %s1545_s12, %s1853_s12   ;;  %s1499_s11 = sphi %s1543_s11, %s1852_s11   ;;  %s1495_s10 = sphi %s1541_s10, %s1851_s10   ;;  %s1491_s9 = sphi %s1539_s9, %s1850_s9  }
   0x8   : > { %p68_p0 = scmp.ne.s32.totalorder %s1499_s11, %s1495_s10  ;;  %p69_p1 = scmp.eq.s32.totalorder %s1511_s14, 0 }
   0x9   : > { %p74_p2 = scmp.ne.s32.totalorder %s1495_s10, %s1491_s9  ;;  %p1576_p3 = scmp.eq.s32.totalorder %s1046_s15, 0 }
   0xa   : > { %p1580_p4 = por %p69_p1, %p68_p0  ;;  %p98_p5 = scmp.eq.s32.totalorder %s1046_s15, 1 }
   0xb   : > { %s1835_s17 = scalar_select %p1576_p3, 1, 0 }
   0xc   : > { %p1586_p6 = por %p1576_p3, %p74_p2  ;;  %p104_p7 = scmp.eq.s32.totalorder %s1047_s16, 1 }
   0xd   : > { %p1590_p8 = por %p98_p5, %p68_p0  ;;  %p1048_p9 = scmp.ge.s32.totalorder %s1511_s14, 1 }
   0xe   : > { %s1837_s19 = scalar_select %p1586_p6, 1, 0 }
   0xf   : > { %s1838_s20 = scalar_select %p1590_p8, 1, 0 }
  0x10   : > { %p1595_p10 = por %p104_p7, %p74_p2  ;;  %p111_p11 = scmp.lt.s32.totalorder %s1511_s14, 3 }
  0x11   : > { %s1513_s23 = smov [#allocation2]   ;;  %p1242_p1 = scmp.lt.s32.totalorder %s1511_s14, 2 }
  0x12   : > { %s1839_s21 = scalar_select %p1595_p10, 1, 0 }
  0x13   : > { %p1600_p12 = pnand %p1048_p9, %p111_p11  ;;  %s123_s24 = sshll.u32 %s1513_s23, 4  ;;  %s1604_s24 = int_to_ptr.vmem [resolvable:$true] %s123_s24 }
  0x14   : > { %p1618_p2 = pnand %p1242_p1, %p1580_p4  ;;  %s31_s27 = sadd.s32 1, %s1507_s13 }
  0x15   : > { %s1840_s22 = scalar_select %p1600_p12, 1, 0 }
  0x16   : > { %p1229_p13 = pneg %p1600_p12  ;;  %s1367_s30 = scalar_lea.hbm %s1826_s0, 1024 }
  0x17   : > { %s1842_s26 = scalar_select %p1618_p2, 1, 0 }
  0x18   : > { %p1612_p5 = pnand %p1229_p13, %p1576_p3  ;;  %p1368_p7 = scmp.ne.s32.totalorder %s1826_s0, %s1367_s30 }
  0x19   : > { %p1374_p4 = scmp.lt.u32.totalorder %s1367_s30, %s1826_s0 }
  0x1a   : > { %p1369_p9 = pneg %p1612_p5 }
  0x1c   : > { %p1370_p11 = pnand %p1369_p9, %p1368_p7 }
  0x1e   : > { %p1371_p13 = pneg %p1370_p11 }
  0x20   : > { %p1376_p1 = pnand %p1374_p4, %p1371_p13 }
  0x22   : > { %1379 = shalt.err (!%p1376_p1)
}
  0x23   : > { %s1380_s7 = scalar_lea.vmem %s1604_s24, 1024  ;;  %p1388_p6 = scmp.lt.s32.totalorder %s1604_s24, %s1604_s24 }
  0x24   : > { %p1381_p0 = scmp.ne.s32.totalorder %s1604_s24, %s1380_s7  ;;  %p1389_p3 = scmp.lt.s32.totalorder %s1380_s7, %s1380_s7 }
  0x26   : > { %p1383_p10 = pnand %p1381_p0, %p1369_p9  ;;  %p1390_p12 = por %p1389_p3, %p1388_p6 }
  0x28   : > { %p1384_p8 = pneg %p1383_p10 }
  0x2a   : > { %p1391_p2 = pnand %p1390_p12, %p1384_p8 }
  0x2c   : > { %1394 = shalt.err (!%p1391_p2)
}
  0x2d   : > { %s1514_s8 = smov 512   ;;  %s1515_s15 = smov 32  }
  0x2e   : > { %1232 = dma.hbm_to_vmem [thread:$0]  (!%p1612_p5), %s1826_s0, 1024, %s1604_s24, [#allocation3], %s1514_s8, %s1514_s8, %s1515_s15  }
  0x2f   : > { %p33_p10 = scmp.ge.s32.totalorder %s31_s27, 2  ;;  %s61_s23 = sadd.s32 1, %s1499_s11 }
  0x30   : > { %s137_s28 = sand.u32 1, %s1499_s11   ;;  %s1052_s3 = sshll.u32 %s1507_s13, 6 }
  0x31   : > { %s1856_s27 = smov (%p33_p10, %s31_s27), 0  ;;  %s1051_s29 = sshll.u32 %s137_s28, 9 }
  0x32   : > { %s57_s30 = ssub.s32 %s1507_s13, %s1856_s27  ;;  %s1654_s25 = scalar_lea.hbm %s1827_s1, %s1052_s3 }
  0x33   : > { %p59_p3 = scmp.eq.s32.totalorder %s57_s30, 0  ;;  %s141_s24 = scalar_lea.vmem [#allocation5], %s1051_s29 }
  0x34   : > { %s150_s6 = sshll.u32 %s141_s24, 4  ;;  %s1661_s8 = scalar_lea.sflag [#allocation6], %s137_s28  ;;  %s1659_s6 = int_to_ptr.vmem [resolvable:$true] %s150_s6 }
  0x35   : > { %s1657_s7 = scalar_select %p59_p3, %s1499_s11, %s61_s23  }
  0x36   : > { %s1395_s15 = scalar_lea.hbm %s1654_s25, 8192  ;;  %p1843_p8 = scmp.ne.s32.totalorder %s1842_s26, 0 }
  0x37   : > { %p1396_p6 = scmp.ne.s32.totalorder %s1654_s25, %s1395_s15  ;;  %s1400_s30 = scalar_lea.hbm %s1827_s1, 16384 }
  0x38   : > { %p1397_p12 = pneg %p1843_p8  ;;  %p1401_p2 = scmp.lt.u32.totalorder %s1654_s25, %s1827_s1 }
  0x39   : > { %p1402_p7 = scmp.lt.u32.totalorder %s1400_s30, %s1395_s15  ;;  %p1404_p11 = scmp.lt.u32.totalorder %s1395_s15, %s1654_s25 }
  0x3a   : > { %p1398_p0 = pnand %p1397_p12, %p1396_p6 }
  0x3b   : > { %p1403_p9 = por %p1402_p7, %p1401_p2 }
  0x3c   : > { %p1399_p5 = pneg %p1398_p0 }
  0x3d   : > { %p1405_p13 = por %p1404_p11, %p1403_p9 }
  0x3f   : > { %p1406_p4 = pnand %p1405_p13, %p1399_p5 }
  0x41   : > { %1409 = shalt.err (!%p1406_p4)
}
  0x42   : > { %s1410_s23 = scalar_lea.vmem %s1659_s6, 8192  ;;  %s1516_s28 = smov [#allocation5]  }
  0x43   : > { %p1411_p1 = scmp.ne.s32.totalorder %s1659_s6, %s1410_s23  ;;  %s1415_s4 = sshll.u32 %s1516_s28, 4  ;;  %s1416_s4 = int_to_ptr.vmem [resolvable:$false] %s1415_s4 }
  0x44   : > { %s1417_s5 = scalar_lea.vmem %s1416_s4, 16384  ;;  %p1418_p6 = scmp.lt.s32.totalorder %s1659_s6, %s1416_s4 }
  0x45   : > { %p1413_p10 = pnand %p1411_p1, %p1397_p12  ;;  %p1419_p0 = scmp.lt.s32.totalorder %s1417_s5, %s1410_s23 }
  0x47   : > { %p1414_p3 = pneg %p1413_p10  ;;  %p1420_p2 = por %p1419_p0, %p1418_p6 }
  0x49   : > { %p1421_p7 = pnand %p1420_p2, %p1414_p3 }
  0x4b   : > { %1424 = shalt.err (!%p1421_p7)
}
  0x4c   : > { %s1517_s24 = smov 128   ;;  %s1518_s15 = smov 64  }
  0x4d   : > { %s1519_s16 = smov 4   ;;  %p1844_p12 = scmp.ne.s32.totalorder %s1840_s22, 0 }
  0x4e   : > { %1236 = dma.hbm_to_vmem [thread:$0]  (!%p1843_p8), %s1654_s25, 8192, %s1659_s6, %s1661_s8, %s1517_s24, %s1518_s15, %s1519_s16  }
  0x4f   : > { %162 = sbr.rel (%p1844_p12) target bundleno = 394 (0x18a), region = 28  ;;  %p1845_p5 = scmp.ne.s32.totalorder (!%p1844_p12), %s1835_s17, 0 }
  0x56   : > { %1478 = dma.done.wait (%p1845_p5), [#allocation3], 1024  }
  0x57   : > { %1480 = vsyncadd (%p1845_p5), [#allocation3], 4294966272  ;;  %s1696_s18 = sand.u32 1, %s1495_s10   ;;  %p1846_p8 = scmp.ne.s32.totalorder %s1837_s19, 0 }
  0x58   : > { %s1055_s30 = sshll.u32 %s1696_s18, 9  ;;  %s169_s29 = scalar_lea.sflag [#allocation6], %s1696_s18 }
  0x59   : > { %s1700_s3 = scalar_lea.vmem [#allocation5], %s1055_s30 }
  0x5a   : > { %1482 = dma.done.wait (%p1846_p8), %s169_s29, 8192  }
  0x5b   : > { %1484 = vsyncadd (%p1846_p8), %s169_s29, 4294959104  ;;  %v1303_v0 = vld [vmem:[%s1700_s3 + $0x40] sm:$0xff]   ;;  %v1307_v4 = vld [vmem:[%s1700_s3 + $0x48] sm:$0xff]   ;;  %s1056_s17 = sshll.u32 %s1696_s18, 4  ;;  %s1130_s19 = sshll.u32 %s1503_s12, 7 }
  0x5c   : > { %v1304_v1 = vld [vmem:[%s1700_s3 + $0xc0] sm:$0xff]   ;;  %1133 = vmatprep.subr.bf16.mxu0 %v1303_v0  ;;  %v1308_v5 = vld [vmem:[%s1700_s3 + $0xc8] sm:$0xff]   ;;  %v1311_v8 = vld [vmem:[%s1700_s3 + $0x50] sm:$0xff]   ;;  %s192_s22 = scalar_lea.vmem [#allocation7], %s1056_s17  ;;  %s1775_s8 = scalar_lea.hbm %s1828_s2, %s1130_s19 }
  0x5d   : > { %v1305_v2 = vld [vmem:[%s1700_s3] sm:$0xff]   ;;  %1155 = vmatprep.subr.bf16.mxu1 %v1304_v1  ;;  %v1309_v6 = vld [vmem:[%s1700_s3 + $0x8] sm:$0xff]   ;;  %v1312_v9 = vld [vmem:[%s1700_s3 + $0xd0] sm:$0xff]   ;;  %s949_s26 = sshll.u32 %s192_s22, 4  ;;  %s937_s23 = scalar_lea.sflag [#allocation4], %s1696_s18  ;;  %s1777_s26 = int_to_ptr.vmem [resolvable:$true] %s949_s26 }
  0x5e   : > { %v1306_v3 = vld [vmem:[%s1700_s3 + $0x80] sm:$0xff]   ;;  %1134 = vmatpush3.bf16.msra.mxu0 %v1305_v2  ;;  %v1310_v7 = vld [vmem:[%s1700_s3 + $0x88] sm:$0xff]   ;;  %v1313_v10 = vld [vmem:[%s1700_s3 + $0x10] sm:$0xff]   ;;  %s1425_s28 = scalar_lea.vmem %s1777_s26, 256  ;;  %p1847_p11 = scmp.ne.s32.totalorder %s1838_s20, 0 }
  0x5f   : > { %1156 = vmatpush3.bf16.msra.mxu1 %v1306_v3  ;;  %1135 = vmatprep.subr.bf16.mxu0 %v1307_v4  ;;  %v1314_v11 = vld [vmem:[%s1700_s3 + $0x90] sm:$0xff]   ;;  %v1315_v12 = vld [vmem:[%s1700_s3 + $0x58] sm:$0xff]   ;;  %v1319_v16 = vld [vmem:[%s1700_s3 + $0x60] sm:$0xff]   ;;  %p1426_p9 = scmp.ne.s32.totalorder %s1777_s26, %s1425_s28  ;;  %s1520_s12 = smov [#allocation7]  }
  0x60   : > { %1157 = vmatprep.subr.bf16.mxu1 %v1308_v5  ;;  %v1316_v13 = vld [vmem:[%s1700_s3 + $0xd8] sm:$0xff]   ;;  %v1320_v17 = vld [vmem:[%s1700_s3 + $0xe0] sm:$0xff]   ;;  %v1323_v20 = vld [vmem:[%s1700_s3 + $0x68] sm:$0xff]   ;;  %s1429_s4 = sshll.u32 %s1520_s12, 4  ;;  %s1430_s4 = int_to_ptr.vmem [resolvable:$false] %s1429_s4 }
  0x61   : > { %v1317_v14 = vld [vmem:[%s1700_s3 + $0x18] sm:$0xff]   ;;  %v1321_v18 = vld [vmem:[%s1700_s3 + $0x20] sm:$0xff]   ;;  %v1324_v21 = vld [vmem:[%s1700_s3 + $0xe8] sm:$0xff]   ;;  %p1427_p13 = pnand %p1426_p9, %p1847_p11  ;;  %s1431_s5 = scalar_lea.vmem %s1430_s4, 512 }
  0x62   : > { %1136 = vmatpush3.bf16.msra.mxu0 %v1309_v6  ;;  %v1318_v15 = vld [vmem:[%s1700_s3 + $0x98] sm:$0xff]   ;;  %v1322_v19 = vld [vmem:[%s1700_s3 + $0xa0] sm:$0xff]   ;;  %v1325_v22 = vld [vmem:[%s1700_s3 + $0x28] sm:$0xff]   ;;  %p1432_p1 = scmp.lt.s32.totalorder %s1777_s26, %s1430_s4  ;;  %p1433_p10 = scmp.lt.s32.totalorder %s1431_s5, %s1425_s28 }
  0x63   : > { %1158 = vmatpush3.bf16.msra.mxu1 %v1310_v7  ;;  %1137 = vmatprep.subr.bf16.mxu0 %v1311_v8  ;;  %v1326_v23 = vld [vmem:[%s1700_s3 + $0xa8] sm:$0xff]   ;;  %v1327_v24 = vld [vmem:[%s1700_s3 + $0x70] sm:$0xff]   ;;  %v1331_v28 = vld [vmem:[%s1700_s3 + $0x78] sm:$0xff]   ;;  %p1428_p4 = pneg %p1427_p13 }
  0x64   : > { %1159 = vmatprep.subr.bf16.mxu1 %v1312_v9  ;;  %v1328_v25 = vld [vmem:[%s1700_s3 + $0xf0] sm:$0xff]   ;;  %v1332_v29 = vld [vmem:[%s1700_s3 + $0xf8] sm:$0xff]   ;;  %v206_v32 = vld [vmem:[#allocation2] sm:$0xff]  ;;  %p1434_p3 = por %p1433_p10, %p1432_p1 }
  0x65   : > { %v1329_v26 = vld [vmem:[%s1700_s3 + $0x30] sm:$0xff]   ;;  %v1333_v30 = vld [vmem:[%s1700_s3 + $0x38] sm:$0xff]   ;;  %v210_v33 = vld [vmem:[#allocation2 + $0x20] sm:$0xff] }
  0x66   : > { %1138 = vmatpush3.bf16.msra.mxu0 %v1313_v10  ;;  %v1330_v27 = vld [vmem:[%s1700_s3 + $0xb0] sm:$0xff]   ;;  %v1334_v31 = vld [vmem:[%s1700_s3 + $0xb8] sm:$0xff]   ;;  %v207_v34 = vld [vmem:[#allocation2 + $0x8] sm:$0xff]  ;;  %v1057_v35 = vcombine.low %v206_v32, %v210_v33  ;;  %v1058_v36 = vcombine.high %v206_v32, %v210_v33  ;;  %p1435_p6 = pnand %p1434_p3, %p1428_p4 }
  0x67   : > { %1160 = vmatpush3.bf16.msra.mxu1 %v1314_v11  ;;  %1139 = vmatprep.subr.bf16.mxu0 %v1315_v12  ;;  %v211_v37 = vld [vmem:[#allocation2 + $0x28] sm:$0xff]  ;;  %v1335_v40 = vld [vmem:[%s1700_s3 + $0x140] sm:$0xff]   ;;  %v1343_v48 = vld [vmem:[%s1700_s3 + $0x150] sm:$0xff]  }
  0x68   : > { %1161 = vmatprep.subr.bf16.mxu1 %v1316_v13  ;;  %v1059_v38 = vcombine.low %v207_v34, %v211_v37  ;;  %v1060_v39 = vcombine.high %v207_v34, %v211_v37  ;;  %800 = vmatprep.mubr.bf16.mxu0 %v1058_v36  ;;  %v1336_v41 = vld [vmem:[%s1700_s3 + $0x1c0] sm:$0xff]   ;;  %v1339_v44 = vld [vmem:[%s1700_s3 + $0x148] sm:$0xff]   ;;  %v1344_v49 = vld [vmem:[%s1700_s3 + $0x1d0] sm:$0xff]  }
  0x69   : > { %v1337_v42 = vld [vmem:[%s1700_s3 + $0x100] sm:$0xff]   ;;  %v1340_v45 = vld [vmem:[%s1700_s3 + $0x1c8] sm:$0xff]   ;;  %v1345_v50 = vld [vmem:[%s1700_s3 + $0x110] sm:$0xff]  }
  0x6a   : > { %1140 = vmatpush3.bf16.msra.mxu0 %v1317_v14  ;;  %841 = vmatprep.mubr.bf16.mxu1 %v1060_v39  ;;  %v1338_v43 = vld [vmem:[%s1700_s3 + $0x180] sm:$0xff]   ;;  %v1341_v46 = vld [vmem:[%s1700_s3 + $0x108] sm:$0xff]   ;;  %v1346_v51 = vld [vmem:[%s1700_s3 + $0x190] sm:$0xff]  }
  0x6b   : > { %1162 = vmatpush3.bf16.msra.mxu1 %v1318_v15  ;;  %1141 = vmatprep.subr.bf16.mxu0 %v1319_v16  ;;  %v1342_v47 = vld [vmem:[%s1700_s3 + $0x188] sm:$0xff]   ;;  %v1347_v52 = vld [vmem:[%s1700_s3 + $0x158] sm:$0xff]   ;;  %v1351_v56 = vld [vmem:[%s1700_s3 + $0x160] sm:$0xff]  }
  0x6c   : > { %1163 = vmatprep.subr.bf16.mxu1 %v1320_v17  ;;  %v1348_v53 = vld [vmem:[%s1700_s3 + $0x1d8] sm:$0xff]   ;;  %v1352_v57 = vld [vmem:[%s1700_s3 + $0x1e0] sm:$0xff]   ;;  %v1355_v60 = vld [vmem:[%s1700_s3 + $0x168] sm:$0xff]  }
  0x6d   : > { %v1349_v54 = vld [vmem:[%s1700_s3 + $0x118] sm:$0xff]   ;;  %v1353_v58 = vld [vmem:[%s1700_s3 + $0x120] sm:$0xff]   ;;  %v1356_v61 = vld [vmem:[%s1700_s3 + $0x1e8] sm:$0xff]  }
  0x6e   : > { %1142 = vmatpush3.bf16.msra.mxu0 %v1321_v18  ;;  %v1350_v55 = vld [vmem:[%s1700_s3 + $0x198] sm:$0xff]   ;;  %v1354_v59 = vld [vmem:[%s1700_s3 + $0x1a0] sm:$0xff]   ;;  %v1357_v62 = vld [vmem:[%s1700_s3 + $0x128] sm:$0xff]  }
  0x6f   : > { %1164 = vmatpush3.bf16.msra.mxu1 %v1322_v19  ;;  %1143 = vmatprep.subr.bf16.mxu0 %v1323_v20  ;;  %v1358_v63 = vld [vmem:[%s1700_s3 + $0x1a8] sm:$0xff]   ;;  %v1359_v0 = vld [vmem:[%s1700_s3 + $0x170] sm:$0xff]   ;;  %v1363_v4 = vld [vmem:[%s1700_s3 + $0x178] sm:$0xff]  }
  0x70   : > { %1165 = vmatprep.subr.bf16.mxu1 %v1324_v21  ;;  %v1360_v1 = vld [vmem:[%s1700_s3 + $0x1f0] sm:$0xff]   ;;  %v1364_v5 = vld [vmem:[%s1700_s3 + $0x1f8] sm:$0xff]  }
  0x71   : > { %v1361_v2 = vld [vmem:[%s1700_s3 + $0x130] sm:$0xff]   ;;  %v1365_v6 = vld [vmem:[%s1700_s3 + $0x138] sm:$0xff]  }
  0x72   : > { %1144 = vmatpush3.bf16.msra.mxu0 %v1325_v22  ;;  %v1362_v3 = vld [vmem:[%s1700_s3 + $0x1b0] sm:$0xff]   ;;  %v1366_v7 = vld [vmem:[%s1700_s3 + $0x1b8] sm:$0xff]  }
  0x73   : > { %1166 = vmatpush3.bf16.msra.mxu1 %v1326_v23  ;;  %1145 = vmatprep.subr.bf16.mxu0 %v1327_v24  ;;  %v208_v8 = vld [vmem:[#allocation2 + $0x10] sm:$0xff]  ;;  %v209_v12 = vld [vmem:[#allocation2 + $0x18] sm:$0xff] }
  0x74   : > { %1167 = vmatprep.subr.bf16.mxu1 %v1328_v25  ;;  %v212_v9 = vld [vmem:[#allocation2 + $0x30] sm:$0xff]  ;;  %v213_v13 = vld [vmem:[#allocation2 + $0x38] sm:$0xff] }
  0x75   : > { %v1061_v10 = vcombine.low %v208_v8, %v212_v9  ;;  %v1062_v11 = vcombine.high %v208_v8, %v212_v9  ;;  %v1063_v14 = vcombine.low %v209_v12, %v213_v13  ;;  %v1064_v15 = vcombine.high %v209_v12, %v213_v13 }
  0x76   : > { %1146 = vmatpush3.bf16.msra.mxu0 %v1329_v26 }
  0x77   : > { %1168 = vmatpush3.bf16.msra.mxu1 %v1330_v27  ;;  %1147 = vmatprep.subr.bf16.mxu0 %v1331_v28 }
  0x78   : > { %1169 = vmatprep.subr.bf16.mxu1 %v1332_v29 }
  0x7a   : > { %1148 = vmatpush3.bf16.msra.mxu0 %v1333_v30 }
  0x7b   : > { %1170 = vmatpush3.bf16.msra.mxu1 %v1334_v31  ;;  %1177 = vmatprep.subr.bf16.mxu0 %v1335_v40 }
  0x7c   : > { %1199 = vmatprep.subr.bf16.mxu1 %v1336_v41 }
  0x7d   : > { %801 = vmatmul.mubr.bf16.vlgmr.msra.gmra.mrb[0].mxu0 %v1057_v35 }
  0x7e   : > { %842 = vmatmul.mubr.bf16.vlgmr.msra.gmra.mrb[0].mxu1 %v1059_v38  ;;  %1178 = vmatpush3.bf16.msra.mxu0 %v1337_v42 }
  0x7f   : > { %1200 = vmatpush3.bf16.msra.mxu1 %v1338_v43  ;;  %1179 = vmatprep.subr.bf16.mxu0 %v1339_v44 }
  0x80   : > { %1201 = vmatprep.subr.bf16.mxu1 %v1340_v45  ;;  %882 = vmatprep.mubr.bf16.mxu0 %v1062_v11 }
  0x81   : > { %923 = vmatprep.mubr.bf16.mxu1 %v1064_v15 }
  0x82   : > { %1180 = vmatpush3.bf16.msra.mxu0 %v1341_v46 }
  0x83   : > { %1202 = vmatpush3.bf16.msra.mxu1 %v1342_v47  ;;  %1181 = vmatprep.subr.bf16.mxu0 %v1343_v48 }
  0x84   : > { %1203 = vmatprep.subr.bf16.mxu1 %v1344_v49 }
  0x86   : > { %1182 = vmatpush3.bf16.msra.mxu0 %v1345_v50 }
  0x87   : > { %1204 = vmatpush3.bf16.msra.mxu1 %v1346_v51  ;;  %1183 = vmatprep.subr.bf16.mxu0 %v1347_v52 }
  0x88   : > { %1205 = vmatprep.subr.bf16.mxu1 %v1348_v53 }
  0x8a   : > { %1184 = vmatpush3.bf16.msra.mxu0 %v1349_v54 }
  0x8b   : > { %1206 = vmatpush3.bf16.msra.mxu1 %v1350_v55  ;;  %1185 = vmatprep.subr.bf16.mxu0 %v1351_v56 }
  0x8c   : > { %1207 = vmatprep.subr.bf16.mxu1 %v1352_v57 }
  0x8e   : > { %1186 = vmatpush3.bf16.msra.mxu0 %v1353_v58 }
  0x8f   : > { %1208 = vmatpush3.bf16.msra.mxu1 %v1354_v59  ;;  %1187 = vmatprep.subr.bf16.mxu0 %v1355_v60 }
  0x90   : > { %1209 = vmatprep.subr.bf16.mxu1 %v1356_v61 }
  0x92   : > { %1188 = vmatpush3.bf16.msra.mxu0 %v1357_v62 }
  0x93   : > { %1210 = vmatpush3.bf16.msra.mxu1 %v1358_v63  ;;  %1189 = vmatprep.subr.bf16.mxu0 %v1359_v0 }
  0x94   : > { %1211 = vmatprep.subr.bf16.mxu1 %v1360_v1 }
  0x96   : > { %1190 = vmatpush3.bf16.msra.mxu0 %v1361_v2 }
  0x97   : > { %1212 = vmatpush3.bf16.msra.mxu1 %v1362_v3  ;;  %1191 = vmatprep.subr.bf16.mxu0 %v1363_v4 }
  0x98   : > { %1213 = vmatprep.subr.bf16.mxu1 %v1364_v5 }
  0x9a   : > { %1192 = vmatpush3.bf16.msra.mxu0 %v1365_v6 }
  0x9b   : > { %1214 = vmatpush3.bf16.msra.mxu1 %v1366_v7 }
  0x9d   : > { %883 = vmatmul.mubr.bf16.vlgmr.msra.gmra.mrb[4].mxu0 %v1061_v10 }
  0x9e   : > { %924 = vmatmul.mubr.bf16.vlgmr.msra.gmra.mrb[4].mxu1 %v1063_v14 }
 0x150   : > { %v1149_v16 = vpop.f32.mrb[0].mxu0 }
 0x151   : > { %v1171_v17 = vpop.f32.mrb[0].mxu1  ;;  %v1150_v18 = vpop.f32.mrb[1].mxu0 }
 0x152   : > { %v1151_v19 = vadd.f32 %v1150_v18, %v1149_v16  ;;  %v1172_v20 = vpop.f32.mrb[1].mxu1  ;;  %v1152_v21 = vpop.f32.mrb[2].mxu0 }
 0x153   : > { %v1173_v22 = vadd.f32 %v1172_v20, %v1171_v17  ;;  %v1174_v23 = vpop.f32.mrb[2].mxu1  ;;  %v1153_v24 = vpop.f32.mrb[3].mxu0 }
 0x154   : > { %v1154_v25 = vadd.f32 %v1153_v24, %v1152_v21  ;;  %v1175_v26 = vpop.f32.mrb[3].mxu1 }
 0x155   : > { %v844_v27 = vadd.f32 %v1173_v22, %v1151_v19  ;;  %v1176_v28 = vadd.f32 %v1175_v26, %v1174_v23 }
 0x157   : > { %v847_v29 = vadd.f32 %v1176_v28, %v1154_v25 }
 0x170   : > { %v1193_v30 = vpop.f32.mrb[4].mxu0 }
 0x171   : > { %v1215_v31 = vpop.f32.mrb[4].mxu1  ;;  %v1194_v32 = vpop.f32.mrb[5].mxu0 }
 0x172   : > { %v1195_v33 = vadd.f32 %v1194_v32, %v1193_v30  ;;  %v1216_v34 = vpop.f32.mrb[5].mxu1  ;;  %v1196_v35 = vpop.f32.mrb[6].mxu0 }
 0x173   : > { %v1217_v36 = vadd.f32 %v1216_v34, %v1215_v31  ;;  %v1218_v37 = vpop.f32.mrb[6].mxu1  ;;  %v1197_v38 = vpop.f32.mrb[7].mxu0 }
 0x174   : > { %v885_v39 = vadd.f32 %v1195_v33, %v844_v27  ;;  %v1198_v40 = vadd.f32 %v1197_v38, %v1196_v35  ;;  %v1219_v41 = vpop.f32.mrb[7].mxu1 }
 0x175   : > { %v1220_v42 = vadd.f32 %v1219_v41, %v1218_v37 }
 0x176   : > { %v926_v43 = vadd.f32 %v1217_v36, %v885_v39  ;;  %v888_v44 = vadd.f32 %v1198_v40, %v847_v29 }
 0x178   : > { %v929_v45 = vadd.f32 %v1220_v42, %v888_v44  ;;  %934 = vst [vmem:[%s192_s22] sm:$0xff] %v926_v43 }
 0x17a   : > { %935 = vst [vmem:[%s192_s22 + $0x8] sm:$0xff] %v929_v45 }
 0x17b   : > { %1438 = shalt.err (!%p1435_p6)
}
 0x17c   : > { %s1439_s24 = scalar_lea.hbm %s1775_s8, 256  ;;  %s1443_s30 = scalar_lea.hbm %s1828_s2, 512 }
 0x17d   : > { %p1440_p0 = scmp.ne.s32.totalorder %s1775_s8, %s1439_s24  ;;  %p1444_p12 = scmp.lt.u32.totalorder %s1775_s8, %s1828_s2 }
 0x17e   : > { %p1445_p5 = scmp.lt.u32.totalorder %s1443_s30, %s1439_s24  ;;  %p1447_p9 = scmp.lt.u32.totalorder %s1439_s24, %s1775_s8 }
 0x17f   : > { %p1441_p2 = pnand %p1440_p0, %p1847_p11 }
 0x180   : > { %p1446_p8 = por %p1445_p5, %p1444_p12 }
 0x181   : > { %p1442_p7 = pneg %p1441_p2 }
 0x182   : > { %p1448_p13 = por %p1447_p9, %p1446_p8 }
 0x184   : > { %p1449_p4 = pnand %p1448_p13, %p1442_p7 }
 0x186   : > { %1452 = shalt.err (!%p1449_p4)
}
 0x187   : > { %s1521_s17 = smov 128   ;;  %s1522_s19 = smov 256  }
 0x188   : > { %s1523_s22 = smov 8  }
 0x189   : > { %1227 = dma.vmem_to_hbm [thread:$0]  (%p1847_p11), %s1777_s26, 256, %s1775_s8, %s937_s23, %s1521_s17, %s1522_s19, %s1523_s22  }
 0x18a PF: > { %s964_s25 = sand.u32 1, %s1491_s9   ;;  %p1848_p1 = scmp.ne.s32.totalorder %s1839_s21, 0 }
 0x18b   : > { %p1849_p10 = scmp.ge.s32.totalorder %s1511_s14, 2  ;;  %s965_s6 = scalar_lea.sflag [#allocation4], %s964_s25 }
 0x18d   : > { %p1238_p3 = pnand %p1849_p10, %p1848_p1 }
 0x18f   : > { %1486 = dma.done.wait (!%p1238_p3), %s965_s6, 256  }
 0x190   : > { %1488 = vsyncadd (!%p1238_p3), %s965_s6, 4294967040  ;;  %s19_s14 = sadd.s32 1, %s1511_s14   ;;  %s1850_s9 = smov %s1495_s10 }
 0x191   : > { %p16_p6 = scmp.ge.s32.totalorder %s19_s14, 4   ;;  %s1851_s10 = smov %s1499_s11 }
 0x192   : > { %s1852_s11 = smov %s1657_s7  ;;  %s1853_s12 = smov %s1507_s13 }
 0x193   : > { %s1854_s13 = smov %s1856_s27  ;;  %18 = sbr.rel (!%p16_p6) target bundleno = 7 (0x7), region = 83 }
 0x19a   :  { %970 = vsyncpa [#allocation3], 1 }
 0x19b   :  { %972 = vsyncpa [#allocation3 + $0x1], 1 }
 0x19c   :  { %973 = vsyncpa [#allocation6], 1 }
 0x19d   :  { %975 = vsyncpa [#allocation6 + $0x1], 1 }
 0x19e   :  { %976 = vsyncpa [#allocation4], 1 }
 0x19f   :  { %978 = vsyncpa [#allocation4 + $0x1], 1 }

</bundles_post_ra>
